<compile_context>
chip_gen: v7x
topology: tpu7x:2x2x1
jax: 0.10.0
libtpu: 0.0.40
codegen_flags: <defaults>
</compile_context>

<pallas_src>
import jax
import jax.numpy as jnp
from jax import lax
from jax.experimental import pallas as pl
from jax.experimental.pallas import tpu as pltpu


def _round_up(x, m):
    return ((x + m - 1) // m) * m


def _cp_score_kernel(q_ref, rhs_ref, out_ref):
    # q_ref   : (B, rank)        -- grid-invariant block (already lhs*rel)
    # rhs_ref : (tile_n, rank)   -- one tile of the rhs embedding table
    # out_ref : (B, tile_n)
    # Contract the rank dims directly (no explicit transpose of the tile).
    out_ref[...] = lax.dot_general(
        q_ref[...],
        rhs_ref[...],
        dimension_numbers=(((1,), (1,)), ((), ())),
        preferred_element_type=jnp.float32,
    ).astype(out_ref.dtype)


def _choose_tile_n(n_ent, rank, b_pad, vmem_budget_bytes=8 * 1024 * 1024):
    # Double-buffered rhs tile + double-buffered output tile per entity column.
    bytes_per_col = 2 * rank * 4 + 2 * b_pad * 4
    tile = vmem_budget_bytes // max(bytes_per_col, 1)
    tile = max(128, (tile // 128) * 128)
    tile = min(tile, _round_up(n_ent, 128))
    return int(tile)


def cp_scores_pallas(q, rhs_weight, *, tile_n=None):
    """q @ rhs_weight.T computed with a Pallas TPU kernel, tiled over entities.

    q          : (B, rank) float32   -- precomputed lhs * rel
    rhs_weight : (n_entities, rank) float32
    returns    : (B, n_entities) float32
    """
    B, rank = q.shape
    n_ent, rank2 = rhs_weight.shape
    assert rank == rank2

    # Pad batch to a sublane multiple for well-aligned output stores.
    b_pad = max(8, _round_up(B, 8))
    if b_pad != B:
        q = jnp.pad(q, ((0, b_pad - B), (0, 0)))

    if tile_n is None:
        tile_n = _choose_tile_n(n_ent, rank, b_pad)
    tile_n = max(128, _round_up(tile_n, 128))
    tile_n = min(tile_n, _round_up(n_ent, 128))

    # Pad the entity axis once so the grid is uniform; padded rows are zero
    # and are sliced away from the result.
    n_pad = _round_up(n_ent, tile_n)
    if n_pad != n_ent:
        rhs_weight = jnp.pad(rhs_weight, ((0, n_pad - n_ent), (0, 0)))

    grid = (n_pad // tile_n,)

    cost = pl.CostEstimate(
        flops=2 * b_pad * rank * n_pad,
        transcendentals=0,
        bytes_accessed=(n_pad * rank * 4) + (b_pad * n_pad * 4) + (b_pad * rank * 4),
    )

    out = pl.pallas_call(
        _cp_score_kernel,
        out_shape=jax.ShapeDtypeStruct((b_pad, n_pad), jnp.float32),
        grid_spec=pltpu.PrefetchScalarGridSpec(
            num_scalar_prefetch=0,
            grid=grid,
            in_specs=[
                pl.BlockSpec((b_pad, rank), lambda j: (0, 0)),   # q (grid-invariant)
                pl.BlockSpec((tile_n, rank), lambda j: (j, 0)),  # rhs table tile
            ],
            out_specs=pl.BlockSpec((b_pad, tile_n), lambda j: (0, j)),
        ),
        compiler_params=pltpu.CompilerParams(
            dimension_semantics=("parallel",),
        ),
        cost_estimate=cost,
    )(q, rhs_weight)

    if b_pad != B or n_pad != n_ent:
        out = out[:B, :n_ent]
    return out


class CPPallas:
    """JAX/Pallas port of the PyTorch CP module (forward pass only)."""

    def __init__(self, sizes, rank, init_size=0.001, seed=0):
        self.sizes = sizes
        self.rank = rank
        k = jax.random.PRNGKey(seed)
        k_lhs, k_rel, k_rhs = jax.random.split(k, 3)
        # nn.Embedding default init is N(0,1); module scales by init_size.
        self.lhs_weight = init_size * jax.random.normal(
            k_lhs, (sizes[0], rank), dtype=jnp.float32)
        self.rel_weight = init_size * jax.random.normal(
            k_rel, (sizes[1], rank), dtype=jnp.float32)
        self.rhs_weight = init_size * jax.random.normal(
            k_rhs, (sizes[2], rank), dtype=jnp.float32)

    def forward(self, x):
        # x: (B, 3) int32 triples (lhs_idx, rel_idx, rhs_idx)
        lhs = jnp.take(self.lhs_weight, x[:, 0], axis=0)   # (B, rank) glue gather
        rel = jnp.take(self.rel_weight, x[:, 1], axis=0)   # (B, rank)
        rhs = jnp.take(self.rhs_weight, x[:, 2], axis=0)   # (B, rank)
        q = lhs * rel                                       # computed once, outside grid
        scores = cp_scores_pallas(q, self.rhs_weight)
        return scores, (lhs, rel, rhs)

    def score(self, x):
        # torch.sum(lhs * rel * rhs, 1, keepdim=True) — small glue reduction.
        lhs = jnp.take(self.lhs_weight, x[:, 0], axis=0)
        rel = jnp.take(self.rel_weight, x[:, 1], axis=0)
        rhs = jnp.take(self.rhs_weight, x[:, 2], axis=0)
        return jnp.sum(lhs * rel * rhs, axis=1, keepdims=True)

    def get_queries(self, x):
        lhs = jnp.take(self.lhs_weight, x[:, 0], axis=0)
        rel = jnp.take(self.rel_weight, x[:, 1], axis=0)
        return lhs * rel

    def get_rhs(self, chunk_begin, chunk_size):
        return self.rhs_weight[chunk_begin:chunk_begin + chunk_size].T


if __name__ == "__main__":
    # Small shapes consistent with the module: sizes = (n_lhs, n_rel, n_rhs)
    sizes = (256, 32, 300)   # non-multiple-of-128 rhs count exercises the ragged path
    rank = 128
    batch = 8

    model = CPPallas(sizes, rank, init_size=0.001, seed=0)

    key = jax.random.PRNGKey(0)
    k0, k1, k2 = jax.random.split(key, 3)
    x = jnp.stack(
        [
            jax.random.randint(k0, (batch,), 0, sizes[0]),
            jax.random.randint(k1, (batch,), 0, sizes[1]),
            jax.random.randint(k2, (batch,), 0, sizes[2]),
        ],
        axis=1,
    ).astype(jnp.int32)

    scores, (lhs, rel, rhs) = model.forward(x)
    scores = jax.block_until_ready(scores)

    # Sanity-check against a pure-JAX reference of the same math.
    ref = (lhs * rel) @ model.rhs_weight.T
    assert scores.shape == (batch, sizes[2])
    assert jnp.allclose(scores, ref, atol=1e-5, rtol=1e-5)

    # Also exercise score() (pure-JAX glue, mirrors CP.score) and a non-aligned
    # batch to hit the batch-padding path.
    s = jax.block_until_ready(model.score(x))
    assert s.shape == (batch, 1)

    scores5, _ = model.forward(x[:5])
    scores5 = jax.block_until_ready(scores5)
    assert scores5.shape == (5, sizes[2])
    assert jnp.allclose(scores5, ref[:5], atol=1e-5, rtol=1e-5)

    print("KERNEL_OK")
</pallas_src>

<mosaic_0001>
module attributes {stable_mosaic.version = 11 : i64} {
  func.func @_cp_score_kernel(%arg0: i32, %arg1: memref<8x128xf32, #tpu.memory_space<vmem>>, %arg2: memref<384x128xf32, #tpu.memory_space<vmem>>, %arg3: memref<8x384xf32, #tpu.memory_space<vmem>>) attributes {dimension_semantics = [#tpu.dimension_semantics<parallel>], iteration_bounds = array<i64: 1>, scalar_prefetch = 0 : i64, scratch_operands = 0 : i64, tpu.core_type = #tpu.core_type<tc>, window_params = [{pipeline_mode = #tpu.pipeline_mode<synchronous>, transform_indices = @transform_0, window_bounds = array<i64: 8, 128>}, {transform_indices = @transform_1, window_bounds = array<i64: 384, 128>}, {transform_indices = @transform_2, window_bounds = array<i64: 8, 384>}]} {
    %c0 = arith.constant 0 : index
    %c0_0 = arith.constant 0 : index
    %0 = vector.load %arg1[%c0, %c0_0] : memref<8x128xf32, #tpu.memory_space<vmem>>, vector<8x128xf32>
    %c0_1 = arith.constant 0 : index
    %c0_2 = arith.constant 0 : index
    %1 = vector.load %arg2[%c0_1, %c0_2] : memref<384x128xf32, #tpu.memory_space<vmem>>, vector<384x128xf32>
    %cst = arith.constant dense<0.000000e+00> : vector<8x384xf32>
    %2 = tpu.matmul %0, %1, %cst {dimension_numbers = #tpu.dot_dimension_numbers<[1], [1], [0], [0], [0, 0, 1, 0], [], []>} : vector<8x128xf32>, vector<384x128xf32>, vector<8x384xf32> -> vector<8x384xf32>
    %c0_3 = arith.constant 0 : index
    %c0_4 = arith.constant 0 : index
    %3 = vector.load %arg3[%c0_3, %c0_4] : memref<8x384xf32, #tpu.memory_space<vmem>>, vector<8x384xf32>
    tpu.vector_store %arg3[%c0_3, %c0_4], %2 {strides = array<i32>} : memref<8x384xf32, #tpu.memory_space<vmem>>, vector<8x384xf32>,
    return
  }
  func.func @transform_0(%arg0: i32) -> (i32, i32) {
    %c0_i32 = arith.constant 0 : i32
    %c0_i32_0 = arith.constant 0 : i32
    %c0_i32_1 = arith.constant 0 : i32
    return %c0_i32, %c0_i32_0 : i32, i32
  }
  func.func @transform_1(%arg0: i32) -> (i32, i32) {
    %c0_i32 = arith.constant 0 : i32
    %c0_i32_0 = arith.constant 0 : i32
    return %arg0, %c0_i32 : i32, i32
  }
  func.func @transform_2(%arg0: i32) -> (i32, i32) {
    %c0_i32 = arith.constant 0 : i32
    %c0_i32_0 = arith.constant 0 : i32
    return %c0_i32, %arg0 : i32, i32
  }
}

</mosaic_0001>

<bundles_post_ra>
// kernel: tpu_custom_call.1
= control target key start
LH: loop header
LB: loop body
LE: loop exit
PB: predicated region body
PF: predicated region fallthrough
CT: control target
= control target key end

     0   :  { %7 = vsyncpa [#allocation3], 0  ;;  %s548_s0 = inlined_call_operand.hbm [shape: f32[8,128], index: 0, kind: input, shape index: {}]   ;;  %s549_s1 = inlined_call_operand.hbm [shape: f32[384,128], index: 1, kind: input, shape index: {}]   ;;  %s550_s2 = inlined_call_operand.hbm [shape: f32[8,384], index: 2, kind: output, shape index: {}]  }
   0x1   :  { %8 = vsyncpa [#allocation6], 0 }
   0x2   :  { %9 = vsyncpa [#allocation4], 0  ;;  %s469_s9 = smov [#allocation2]   ;;  %s470_s11 = smov [#allocation5]  }
   0x3   :  { %s16_s10 = sshll.u32 %s469_s9, 4  ;;  %s25_s12 = sshll.u32 %s470_s11, 4  ;;  %s17_s10 = int_to_ptr.vmem [resolvable:$true] %s16_s10  ;;  %s492_s12 = int_to_ptr.vmem [resolvable:$true] %s25_s12 }
   0x4   :  { %s397_s15 = scalar_lea.hbm %s548_s0, 128 }
   0x5   :  { %p398_p0 = scmp.ne.s32.totalorder %s548_s0, %s397_s15  ;;  %p401_p1 = scmp.lt.u32.totalorder %s397_s15, %s548_s0 }
   0x7   :  { %p403_p2 = pnand %p401_p1, %p398_p0 }
   0x9   :  { %406 = shalt.err (!%p403_p2)
}
   0xa   :  { %s407_s20 = scalar_lea.vmem %s17_s10, 128  ;;  %p412_p4 = scmp.lt.s32.totalorder %s17_s10, %s17_s10 }
   0xb   :  { %p408_p3 = scmp.ne.s32.totalorder %s17_s10, %s407_s20  ;;  %p413_p5 = scmp.lt.s32.totalorder %s407_s20, %s407_s20 }
   0xd   :  { %p414_p6 = por %p413_p5, %p412_p4 }
   0xf   :  { %p415_p7 = pnand %p414_p6, %p408_p3 }
  0x11   :  { %418 = shalt.err (!%p415_p7)
}
  0x12   :  { %19 = dma.hbm_to_vmem [thread:$0]  %s548_s0, 128, %s17_s10, [#allocation3]  }
  0x13   :  { %s419_s25 = scalar_lea.hbm %s549_s1, 6144 }
  0x14   :  { %p420_p8 = scmp.ne.s32.totalorder %s549_s1, %s419_s25  ;;  %p423_p9 = scmp.lt.u32.totalorder %s419_s25, %s549_s1 }
  0x16   :  { %p425_p10 = pnand %p423_p9, %p420_p8 }
  0x18   :  { %428 = shalt.err (!%p425_p10)
}
  0x19   :  { %s429_s30 = scalar_lea.vmem %s492_s12, 6144  ;;  %p434_p12 = scmp.lt.s32.totalorder %s492_s12, %s492_s12 }
  0x1a   :  { %p430_p11 = scmp.ne.s32.totalorder %s492_s12, %s429_s30  ;;  %p435_p13 = scmp.lt.s32.totalorder %s429_s30, %s429_s30 }
  0x1c   :  { %p436_p0 = por %p435_p13, %p434_p12 }
  0x1e   :  { %p437_p1 = pnand %p436_p0, %p430_p11 }
  0x20   :  { %440 = shalt.err (!%p437_p1)
}
  0x21   :  { %s471_s0 = smov 128   ;;  %s472_s3 = smov 8  }
  0x22   :  { %31 = dma.hbm_to_vmem [thread:$0]  %s549_s1, 6144, %s492_s12, [#allocation6], %s471_s0, %s471_s0, %s472_s3  }
  0x23   :  { %463 = dma.done.wait [#allocation3], 128  }
  0x24   :  { %464 = vsyncadd [#allocation3], 4294967168 }
  0x25   :  { %465 = dma.done.wait [#allocation6], 6144  }
  0x26   :  { %466 = vsyncadd [#allocation6], 4294961152  ;;  %v473_v0 = vmov 0.0|0.0   ;;  %vm474_vm0 = vmmov 0   ;;  %v475_v1 = vmov 0.0   ;;  %v55_v2 = vld [vmem:[#allocation5 + $0x80] sm:$0xff] }
  0x27   :  { %365 = vmatprep.subr.bf16.mxu1 %v473_v0  ;;  %330 = vmatprep.mubr.msk.f32.mxu1 %vm474_vm0, %v475_v1  ;;  %v56_v3 = vld [vmem:[#allocation5 + $0x88] sm:$0xff]  ;;  %v39_v4 = vld [vmem:[#allocation5] sm:$0xff]  ;;  %v57_v11 = vld [vmem:[#allocation5 + $0x90] sm:$0xff]  ;;  %s476_s1 = smov [#allocation7]  }
  0x28   :  { %v333_v5 = vpack.c.bf16 %v56_v3, %v55_v2  ;;  %v40_v6 = vld [vmem:[#allocation5 + $0x8] sm:$0xff]  ;;  %v71_v7 = vld [vmem:[#allocation5 + $0x100] sm:$0xff]  ;;  %v58_v12 = vld [vmem:[#allocation5 + $0x98] sm:$0xff]  ;;  %s237_s6 = sshll.u32 %s476_s1, 4  ;;  %s238_s6 = int_to_ptr.vmem [resolvable:$true] %s237_s6 }
  0x29   :  { %v72_v8 = vld [vmem:[#allocation5 + $0x108] sm:$0xff]  ;;  %v335_v9 = vpack.c.bf16 %v40_v6, %v39_v4  ;;  %v337_v13 = vpack.c.bf16 %v58_v12, %v57_v11  ;;  %v41_v14 = vld [vmem:[#allocation5 + $0x10] sm:$0xff]  ;;  %v42_v15 = vld [vmem:[#allocation5 + $0x18] sm:$0xff]  ;;  %s441_s7 = scalar_lea.vmem %s238_s6, 384  ;;  %p446_p3 = scmp.lt.s32.totalorder %s238_s6, %s238_s6 }
  0x2a   :  { %v366_v10 = vpack.c.bf16 %v72_v8, %v71_v7  ;;  %334 = vmatprep.subr.bf16.mxu0 %v333_v5  ;;  %v73_v16 = vld [vmem:[#allocation5 + $0x110] sm:$0xff]  ;;  %v74_v17 = vld [vmem:[#allocation5 + $0x118] sm:$0xff]  ;;  %v59_v18 = vld [vmem:[#allocation5 + $0xa0] sm:$0xff]  ;;  %v339_v20 = vpack.c.bf16 %v42_v15, %v41_v14  ;;  %p442_p2 = scmp.ne.s32.totalorder %s238_s6, %s441_s7  ;;  %p447_p4 = scmp.lt.s32.totalorder %s441_s7, %s441_s7 }
  0x2b   :  { %336 = vmatpush3.bf16.xpose.msra.mxu0 %v335_v9  ;;  %v60_v19 = vld [vmem:[#allocation5 + $0xa8] sm:$0xff]  ;;  %v369_v21 = vpack.c.bf16 %v74_v17, %v73_v16  ;;  %v43_v23 = vld [vmem:[#allocation5 + $0x20] sm:$0xff]  ;;  %v61_v27 = vld [vmem:[#allocation5 + $0xb0] sm:$0xff] }
  0x2c   :  { %367 = vmatpush3.bf16.xpose.msra.mxu1 %v366_v10  ;;  %338 = vmatprep.subr.bf16.mxu0 %v337_v13  ;;  %v341_v22 = vpack.c.bf16 %v60_v19, %v59_v18  ;;  %v44_v24 = vld [vmem:[#allocation5 + $0x28] sm:$0xff]  ;;  %v75_v25 = vld [vmem:[#allocation5 + $0x120] sm:$0xff]  ;;  %v62_v28 = vld [vmem:[#allocation5 + $0xb8] sm:$0xff]  ;;  %p448_p5 = por %p447_p4, %p446_p3 }
  0x2d   :  { %368 = vmatprep.subr.bf16.mxu1 %v473_v0  ;;  %v76_v26 = vld [vmem:[#allocation5 + $0x128] sm:$0xff]  ;;  %v343_v29 = vpack.c.bf16 %v44_v24, %v43_v23  ;;  %v526_v31 = vld [vmem:[#allocation2] sm:$0xff]  ;;  %v345_v32 = vpack.c.bf16 %v62_v28, %v61_v27  ;;  %v45_v33 = vld [vmem:[#allocation5 + $0x30] sm:$0xff] }
  0x2e   :  { %v372_v30 = vpack.c.bf16 %v76_v26, %v75_v25  ;;  %279 = vmatprep.mubr.f32.mxu0 %v526_v31  ;;  %v46_v34 = vld [vmem:[#allocation5 + $0x38] sm:$0xff]  ;;  %v77_v35 = vld [vmem:[#allocation5 + $0x130] sm:$0xff]  ;;  %v63_v37 = vld [vmem:[#allocation5 + $0xc0] sm:$0xff]  ;;  %p449_p6 = pnand %p448_p5, %p442_p2 }
  0x2f   :  { %v78_v36 = vld [vmem:[#allocation5 + $0x138] sm:$0xff]  ;;  %v64_v38 = vld [vmem:[#allocation5 + $0xc8] sm:$0xff]  ;;  %v347_v39 = vpack.c.bf16 %v46_v34, %v45_v33  ;;  %v47_v42 = vld [vmem:[#allocation5 + $0x40] sm:$0xff] }
  0x30   :  { %v375_v40 = vpack.c.bf16 %v78_v36, %v77_v35  ;;  %v349_v41 = vpack.c.bf16 %v64_v38, %v63_v37  ;;  %v48_v43 = vld [vmem:[#allocation5 + $0x48] sm:$0xff]  ;;  %v79_v44 = vld [vmem:[#allocation5 + $0x140] sm:$0xff]  ;;  %v65_v46 = vld [vmem:[#allocation5 + $0xd0] sm:$0xff] }
  0x31   :  { %v80_v45 = vld [vmem:[#allocation5 + $0x148] sm:$0xff]  ;;  %v66_v47 = vld [vmem:[#allocation5 + $0xd8] sm:$0xff]  ;;  %v351_v48 = vpack.c.bf16 %v48_v43, %v47_v42  ;;  %v49_v51 = vld [vmem:[#allocation5 + $0x50] sm:$0xff] }
  0x32   :  { %v378_v49 = vpack.c.bf16 %v80_v45, %v79_v44  ;;  %v353_v50 = vpack.c.bf16 %v66_v47, %v65_v46  ;;  %v50_v52 = vld [vmem:[#allocation5 + $0x58] sm:$0xff]  ;;  %v81_v53 = vld [vmem:[#allocation5 + $0x150] sm:$0xff]  ;;  %v67_v55 = vld [vmem:[#allocation5 + $0xe0] sm:$0xff] }
  0x33   :  { %340 = vmatpush3.bf16.xpose.msra.mxu0 %v339_v20  ;;  %v82_v54 = vld [vmem:[#allocation5 + $0x158] sm:$0xff]  ;;  %v68_v56 = vld [vmem:[#allocation5 + $0xe8] sm:$0xff]  ;;  %v355_v57 = vpack.c.bf16 %v50_v52, %v49_v51  ;;  %v51_v60 = vld [vmem:[#allocation5 + $0x60] sm:$0xff] }
  0x34   :  { %370 = vmatpush3.bf16.xpose.msra.mxu1 %v369_v21  ;;  %342 = vmatprep.subr.bf16.mxu0 %v341_v22  ;;  %v381_v58 = vpack.c.bf16 %v82_v54, %v81_v53  ;;  %v357_v59 = vpack.c.bf16 %v68_v56, %v67_v55  ;;  %v52_v61 = vld [vmem:[#allocation5 + $0x68] sm:$0xff]  ;;  %v83_v62 = vld [vmem:[#allocation5 + $0x160] sm:$0xff]  ;;  %v69_v1 = vld [vmem:[#allocation5 + $0xf0] sm:$0xff] }
  0x35   :  { %371 = vmatprep.subr.bf16.mxu1 %v473_v0  ;;  %v84_v63 = vld [vmem:[#allocation5 + $0x168] sm:$0xff]  ;;  %v70_v2 = vld [vmem:[#allocation5 + $0xf8] sm:$0xff]  ;;  %v359_v3 = vpack.c.bf16 %v52_v61, %v51_v60  ;;  %v53_v6 = vld [vmem:[#allocation5 + $0x70] sm:$0xff] }
  0x36   :  { %v384_v4 = vpack.c.bf16 %v84_v63, %v83_v62  ;;  %v361_v5 = vpack.c.bf16 %v70_v2, %v69_v1  ;;  %v54_v7 = vld [vmem:[#allocation5 + $0x78] sm:$0xff]  ;;  %v85_v8 = vld [vmem:[#allocation5 + $0x170] sm:$0xff] }
  0x37   :  { %v86_v9 = vld [vmem:[#allocation5 + $0x178] sm:$0xff]  ;;  %v363_v10 = vpack.c.bf16 %v54_v7, %v53_v6 }
  0x38   :  { %v387_v11 = vpack.c.bf16 %v86_v9, %v85_v8 }
  0x3b   :  { %344 = vmatpush3.bf16.xpose.msra.mxu0 %v343_v29 }
  0x3c   :  { %373 = vmatpush3.bf16.xpose.msra.mxu1 %v372_v30  ;;  %346 = vmatprep.subr.bf16.mxu0 %v345_v32 }
  0x3d   :  { %374 = vmatprep.subr.bf16.mxu1 %v473_v0 }
  0x43   :  { %348 = vmatpush3.bf16.xpose.msra.mxu0 %v347_v39 }
  0x44   :  { %376 = vmatpush3.bf16.xpose.msra.mxu1 %v375_v40  ;;  %350 = vmatprep.subr.bf16.mxu0 %v349_v41 }
  0x45   :  { %377 = vmatprep.subr.bf16.mxu1 %v473_v0 }
  0x4b   :  { %352 = vmatpush3.bf16.xpose.msra.mxu0 %v351_v48 }
  0x4c   :  { %379 = vmatpush3.bf16.xpose.msra.mxu1 %v378_v49  ;;  %354 = vmatprep.subr.bf16.mxu0 %v353_v50 }
  0x4d   :  { %380 = vmatprep.subr.bf16.mxu1 %v473_v0 }
  0x53   :  { %356 = vmatpush3.bf16.xpose.msra.mxu0 %v355_v57 }
  0x54   :  { %382 = vmatpush3.bf16.xpose.msra.mxu1 %v381_v58  ;;  %358 = vmatprep.subr.bf16.mxu0 %v357_v59 }
  0x55   :  { %383 = vmatprep.subr.bf16.mxu1 %v473_v0 }
  0x5b   :  { %360 = vmatpush3.bf16.xpose.msra.mxu0 %v359_v3 }
  0x5c   :  { %385 = vmatpush3.bf16.xpose.msra.mxu1 %v384_v4  ;;  %362 = vmatprep.subr.bf16.mxu0 %v361_v5 }
  0x5d   :  { %386 = vmatprep.subr.bf16.mxu1 %v473_v0 }
  0x63   :  { %364 = vmatpush3.bf16.xpose.msra.mxu0 %v363_v10 }
  0x64   :  { %388 = vmatpush3.bf16.xpose.msra.mxu1 %v387_v11 }
  0x6a   :  { %280 = vmatmul.mubr.f32.vlgmr.msra.gmra.mrb[0].mxu0 %v526_v31 }
  0x6b   :  { %331 = vmatmul.mubr.f32.vlgmr.msra.gmra.mrb[0].mxu1 %v526_v31 }
 0x13d   :  { %v153_v12 = vpop.f32.mrb[0].mxu0 }
 0x13e   :  { %v224_v13 = vpop.f32.mrb[0].mxu1  ;;  %228 = vst [vmem:[#allocation7] sm:$0xff] %v153_v12  ;;  %v155_v14 = vpop.f32.mrb[1].mxu0 }
 0x13f   :  { %230 = vst [vmem:[#allocation7 + $0x10] sm:$0xff] %v224_v13  ;;  %v332_v0 = vpop.f32.mrb[1].mxu1  ;;  %229 = vst [vmem:[#allocation7 + $0x8] sm:$0xff] %v155_v14 }
 0x140   :  { %452 = shalt.err (!%p449_p6)
}
 0x141   :  { %s453_s10 = scalar_lea.hbm %s550_s2, 384 }
 0x142   :  { %p454_p7 = scmp.ne.s32.totalorder %s550_s2, %s453_s10  ;;  %p457_p8 = scmp.lt.u32.totalorder %s453_s10, %s550_s2 }
 0x144   :  { %p459_p9 = pnand %p457_p8, %p454_p7 }
 0x146   :  { %462 = shalt.err (!%p459_p9)
}
 0x147   :  { %240 = dma.vmem_to_hbm [thread:$0]  %s238_s6, 384, %s550_s2, [#allocation4]  }
 0x148   :  { %467 = dma.done.wait [#allocation4], 384  }
 0x149   :  { %468 = vsyncadd [#allocation4], 4294966912 }
 0x14a   :  { %244 = vsyncpa [#allocation3], 1 }
 0x14b   :  { %245 = vsyncpa [#allocation6], 1 }
 0x14c   :  { %246 = vsyncpa [#allocation4], 1 }

</bundles_post_ra>
